<compile_context>
chip_gen: v6e
topology: v6e:2x2x1
jax: 0.10.0
libtpu: 0.0.40
codegen_flags: <defaults>
</compile_context>

<pallas_src>
import numpy as np
import jax
import jax.numpy as jnp
from jax import lax
from jax.experimental import pallas as pl
from jax.experimental.pallas import tpu as pltpu


# ----------------------------- parameter setup ------------------------------
def get_binary_omega_list(omega, minority_class=1):
    if minority_class == 1:
        weights = [1.0 - omega, omega]
    else:
        weights = [omega, 1.0 - omega]
    return np.asarray(weights, dtype=np.float32)


def get_delta_list(class_dist, gamma):
    temp = (1.0 / np.array(class_dist, dtype=np.float64)) ** gamma
    delta_list = temp / np.min(temp)
    return delta_list.astype(np.float32)


def get_iota_list(class_dist, tau):
    class_dist = np.array(class_dist, dtype=np.float64)
    cls_probs = class_dist / class_dist.sum()
    iota_list = tau * np.log(cls_probs)
    return iota_list.astype(np.float32)


def get_omega_list(class_dist, k=1):
    per_cls_weights = 1.0 / np.array(class_dist, dtype=np.float64) ** k
    per_cls_weights = per_cls_weights / np.sum(per_cls_weights) * len(class_dist)
    return per_cls_weights.astype(np.float32)


def _round_up(v, m):
    return ((v + m - 1) // m) * m


# --------------------------------- kernel -----------------------------------
def _make_vs_loss_kernel(n_rows, tile_n, tiles_per_core):
    def kernel(x_ref, tgt_ref, params_ref, out_ref, acc_num_ref, acc_den_ref):
        core = pl.program_id(0)
        i = pl.program_id(1)

        @pl.when(i == 0)
        def _init():
            acc_num_ref[...] = jnp.zeros_like(acc_num_ref)
            acc_den_ref[...] = jnp.zeros_like(acc_den_ref)

        x = x_ref[...].astype(jnp.float32)            # (tile_n, C)
        tgt = tgt_ref[...]                            # (tile_n, 1) int32
        params = params_ref[...]                      # (3, C) f32: [1/delta, iota, omega]
        inv_delta = params[0:1, :]
        iota = params[1:2, :]
        omega = params[2:3, :]

        tn, nc = x.shape

        # VS-Loss logit adjustment: reciprocal-multiply instead of per-element divide.
        out = x * inv_delta + iota                    # (tile_n, C)

        # Numerically stable log-sum-exp over classes; everything stays 2-D.
        m = jnp.max(out, axis=-1, keepdims=True)                               # (tn, 1)
        lse = m + jnp.log(jnp.sum(jnp.exp(out - m), axis=-1, keepdims=True))   # (tn, 1)

        # Fused one-hot * per-class weight (single (tn, C) pass).
        cls = lax.broadcasted_iota(jnp.int32, (tn, nc), 1)
        wom = jnp.where(cls == tgt, omega, 0.0)                                # (tn, C)
        w = jnp.sum(wom, axis=-1, keepdims=True)                               # (tn, 1)
        row_num = jnp.sum(wom * (lse - out), axis=-1, keepdims=True)           # (tn, 1)

        # Mask padded / overhanging rows of remainder tiles (select, not multiply,
        # so garbage rows can never inject NaN/Inf into the sums).
        row0 = (core * tiles_per_core + i) * tile_n
        rid = row0 + lax.broadcasted_iota(jnp.int32, (tn, 1), 0)
        valid = rid < n_rows
        row_num = jnp.where(valid, row_num, 0.0)
        w = jnp.where(valid, w, 0.0)

        acc_num_ref[...] += jnp.sum(row_num, axis=0, keepdims=True)
        acc_den_ref[...] += jnp.sum(w, axis=0, keepdims=True)

        @pl.when(i == tiles_per_core - 1)
        def _finalize():
            out_ref[:, 0:1, :] = acc_num_ref[...].reshape(1, 1, 1)
            out_ref[:, 1:2, :] = acc_den_ref[...].reshape(1, 1, 1)

    return kernel


# -------------------------------- wrapper -----------------------------------
def vs_loss(x, target, delta_list, iota_list, omega_list, *, max_tile_n=512):
    x = jnp.asarray(x)
    n, c = x.shape
    tgt = jnp.asarray(target).reshape(n, 1).astype(jnp.int32)

    # Fuse per-class params into one pinned (3, C) block: [1/delta, iota, omega].
    inv_delta = 1.0 / jnp.asarray(delta_list, jnp.float32)
    params = jnp.stack(
        [inv_delta,
         jnp.asarray(iota_list, jnp.float32),
         jnp.asarray(omega_list, jnp.float32)],
        axis=0,
    )  # (3, C)

    # Tile selection: keep double-buffered x tiles small enough for every TPU
    # generation (v7x has only 64 MiB VMEM / 32 MiB scoped default).
    itemsize = jnp.dtype(x.dtype).itemsize
    budget = 8 * 1024 * 1024  # bytes reserved for pipelined x buffers
    max_rows = max(8, budget // (4 * max(c, 1) * max(itemsize, 1)))
    tile_n = min(max_tile_n, int(max_rows), _round_up(n, 8))
    tile_n = max(8, (tile_n // 8) * 8)

    nblocks = pl.cdiv(n, tile_n)
    num_cores = min(2, nblocks)          # leading "parallel" axis -> 2 TCs on v7x
    tpc = pl.cdiv(nblocks, num_cores)    # logical tiles per core

    def data_map(cc, i):
        # Clamp so an overhanging logical tile re-reads the last real block;
        # its rows are masked out inside the kernel anyway.
        return (jnp.minimum(cc * tpc + i, nblocks - 1), 0)

    kernel = _make_vs_loss_kernel(n, tile_n, tpc)

    cost = pl.CostEstimate(
        flops=10 * n * c,
        transcendentals=n * (c + 1),
        bytes_accessed=n * c * itemsize + n * 4 + 3 * c * 4 + num_cores * 8,
    )

    partials = pl.pallas_call(
        kernel,
        out_shape=jax.ShapeDtypeStruct((num_cores, 2, 1), jnp.float32),
        grid_spec=pltpu.PrefetchScalarGridSpec(
            num_scalar_prefetch=0,
            grid=(num_cores, tpc),
            in_specs=[
                pl.BlockSpec((tile_n, c), data_map),          # logits
                pl.BlockSpec((tile_n, 1), data_map),          # targets
                pl.BlockSpec((3, c), lambda cc, i: (0, 0)),   # pinned params
            ],
            out_specs=pl.BlockSpec((1, 2, 1), lambda cc, i: (cc, 0, 0)),
            scratch_shapes=[
                pltpu.VMEM((1, 1), jnp.float32),   # running numerator
                pltpu.VMEM((1, 1), jnp.float32),   # running denominator
            ],
        ),
        compiler_params=pltpu.CompilerParams(
            dimension_semantics=("parallel", "arbitrary"),
            vmem_limit_bytes=32 * 1024 * 1024,
        ),
        cost_estimate=cost,
    )(x, tgt, params)

    num = jnp.sum(partials[:, 0, 0])
    den = jnp.sum(partials[:, 1, 0])
    # PyTorch weighted cross_entropy 'mean' semantics: sum(w_i * nll_i) / sum(w_i)
    return num / den


class VSLoss:
    """Mirror of the PyTorch VSLoss module (forward pass only)."""

    def __init__(self, class_dist, omega=0.5, gamma=0.3, tau=1.0):
        if len(class_dist) == 2:
            self.omega_list = jnp.asarray(get_binary_omega_list(omega))
        else:
            self.omega_list = jnp.asarray(get_omega_list(class_dist, k=1))
        self.delta_list = jnp.asarray(get_delta_list(class_dist, gamma))
        self.iota_list = jnp.asarray(get_iota_list(class_dist, tau))

    def __call__(self, x, target):
        return vs_loss(x, target, self.delta_list, self.iota_list, self.omega_list)


# ------------------------------ reference (JAX) ------------------------------
def vs_loss_ref(x, target, delta_list, iota_list, omega_list):
    out = x / delta_list[None, :] + iota_list[None, :]
    logp = jax.nn.log_softmax(out, axis=-1)
    nll = -jnp.take_along_axis(logp, target[:, None], axis=-1)[:, 0]
    w = omega_list[target]
    return jnp.sum(w * nll) / jnp.sum(w)


if __name__ == "__main__":
    key = jax.random.PRNGKey(0)
    k1, k2, k3, k4 = jax.random.split(key, 4)

    # Case 1: binary imbalance (exercises the binary-omega branch), N=8, C=2.
    loss_mod = VSLoss([90, 10], omega=0.7, gamma=0.3, tau=1.0)
    x1 = jax.random.normal(k1, (8, 2), dtype=jnp.float32)
    t1 = jax.random.randint(k2, (8,), 0, 2, dtype=jnp.int32)
    out1 = jax.block_until_ready(loss_mod(x1, t1))
    ref1 = vs_loss_ref(x1, t1, loss_mod.delta_list, loss_mod.iota_list, loss_mod.omega_list)
    assert jnp.allclose(out1, ref1, rtol=1e-5, atol=1e-5), (out1, ref1)

    # Case 2: multi-class, batch not a multiple of the tile -> remainder mask path.
    loss_mod2 = VSLoss([50, 30, 15, 5], gamma=0.3, tau=1.0)
    x2 = jax.random.normal(k3, (13, 4), dtype=jnp.float32)
    t2 = jax.random.randint(k4, (13,), 0, 4, dtype=jnp.int32)
    out2 = jax.block_until_ready(loss_mod2(x2, t2))
    ref2 = vs_loss_ref(x2, t2, loss_mod2.delta_list, loss_mod2.iota_list, loss_mod2.omega_list)
    assert jnp.allclose(out2, ref2, rtol=1e-5, atol=1e-5), (out2, ref2)

    print("KERNEL_OK")
</pallas_src>

<mosaic_0001>
module attributes {stable_mosaic.version = 11 : i64} {
  func.func @kernel(%arg0: i32, %arg1: i32, %arg2: memref<8x2xf32, #tpu.memory_space<vmem>>, %arg3: memref<8x1xi32, #tpu.memory_space<vmem>>, %arg4: memref<3x2xf32, #tpu.memory_space<vmem>>, %arg5: memref<1x2x1xf32, #tpu.memory_space<vmem>>, %arg6: memref<1x1xf32, #tpu.memory_space<vmem>>, %arg7: memref<1x1xf32, #tpu.memory_space<vmem>>) attributes {dimension_semantics = [#tpu.dimension_semantics<parallel>, #tpu.dimension_semantics<arbitrary>], iteration_bounds = array<i64: 1, 1>, scalar_prefetch = 0 : i64, scratch_operands = 2 : i64, tpu.core_type = #tpu.core_type<tc>, window_params = [{transform_indices = @transform_0, window_bounds = array<i64: 8, 2>}, {transform_indices = @transform_1, window_bounds = array<i64: 8, 1>}, {pipeline_mode = #tpu.pipeline_mode<synchronous>, transform_indices = @transform_2, window_bounds = array<i64: 3, 2>}, {transform_indices = @transform_3, window_bounds = array<i64: 1, 2, 1>}]} {
    %c0_i32 = arith.constant 0 : i32
    %0 = arith.cmpi eq, %arg1, %c0_i32 : i32
    %1 = arith.extui %0 : i1 to i32
    %c0_i32_0 = arith.constant 0 : i32
    %2 = arith.cmpi ne, %1, %c0_i32_0 : i32
    scf.if %2 {
      %cst_25 = arith.constant 0.000000e+00 : f32
      %61 = vector.broadcast %cst_25 : f32 to vector<1x1xf32>
      %c0_26 = arith.constant 0 : index
      %c0_27 = arith.constant 0 : index
      %62 = vector.load %arg6[%c0_26, %c0_27] : memref<1x1xf32, #tpu.memory_space<vmem>>, vector<1x1xf32>
      tpu.vector_store %arg6[%c0_26, %c0_27], %61 {strides = array<i32>} : memref<1x1xf32, #tpu.memory_space<vmem>>, vector<1x1xf32>,
      %cst_28 = arith.constant 0.000000e+00 : f32
      %63 = vector.broadcast %cst_28 : f32 to vector<1x1xf32>
      %c0_29 = arith.constant 0 : index
      %c0_30 = arith.constant 0 : index
      %64 = vector.load %arg7[%c0_29, %c0_30] : memref<1x1xf32, #tpu.memory_space<vmem>>, vector<1x1xf32>
      tpu.vector_store %arg7[%c0_29, %c0_30], %63 {strides = array<i32>} : memref<1x1xf32, #tpu.memory_space<vmem>>, vector<1x1xf32>,
    } else {
    }
    %c0 = arith.constant 0 : index
    %c0_1 = arith.constant 0 : index
    %3 = vector.load %arg2[%c0, %c0_1] : memref<8x2xf32, #tpu.memory_space<vmem>>, vector<8x2xf32>
    %c0_2 = arith.constant 0 : index
    %c0_3 = arith.constant 0 : index
    %4 = vector.load %arg3[%c0_2, %c0_3] : memref<8x1xi32, #tpu.memory_space<vmem>>, vector<8x1xi32>
    %c0_4 = arith.constant 0 : index
    %c0_5 = arith.constant 0 : index
    %5 = vector.load %arg4[%c0_4, %c0_5] : memref<3x2xf32, #tpu.memory_space<vmem>>, vector<3x2xf32>
    %6 = vector.extract_strided_slice %5 {offsets = [0, 0], sizes = [1, 2], strides = [1, 1]} : vector<3x2xf32> to vector<1x2xf32>
    %7 = vector.extract_strided_slice %5 {offsets = [1, 0], sizes = [1, 2], strides = [1, 1]} : vector<3x2xf32> to vector<1x2xf32>
    %8 = vector.extract_strided_slice %5 {offsets = [2, 0], sizes = [1, 2], strides = [1, 1]} : vector<3x2xf32> to vector<1x2xf32>
    %9 = vector.broadcast %6 : vector<1x2xf32> to vector<8x2xf32>
    %10 = arith.mulf %3, %9 : vector<8x2xf32>
    %11 = vector.broadcast %7 : vector<1x2xf32> to vector<8x2xf32>
    %12 = arith.addf %10, %11 : vector<8x2xf32>
    %cst = arith.constant dense<0xFF800000> : vector<8xf32>
    %13 = vector.multi_reduction <maximumf>, %12, %cst [1] : vector<8x2xf32> to vector<8xf32>
    %14 = vector.shape_cast %13 : vector<8xf32> to vector<8x1xf32>
    %15 = vector.broadcast %14 : vector<8x1xf32> to vector<8x2xf32>
    %16 = arith.subf %12, %15 : vector<8x2xf32>
    %17 = math.exp %16 : vector<8x2xf32>
    %cst_6 = arith.constant dense<0.000000e+00> : vector<8xf32>
    %18 = vector.multi_reduction <add>, %17, %cst_6 [1] : vector<8x2xf32> to vector<8xf32>
    %19 = vector.shape_cast %18 : vector<8xf32> to vector<8x1xf32>
    %20 = math.log %19 : vector<8x1xf32>
    %21 = arith.addf %14, %20 : vector<8x1xf32>
    %22 = tpu.iota {dimensions = array<i32: 1>} : vector<8x2xi32>
    %23 = vector.broadcast %4 : vector<8x1xi32> to vector<8x2xi32>
    %24 = arith.cmpi eq, %22, %23 : vector<8x2xi32>
    %cst_7 = arith.constant 0.000000e+00 : f32
    %25 = vector.shape_cast %8 : vector<1x2xf32> to vector<1x2xf32>
    %26 = vector.broadcast %25 : vector<1x2xf32> to vector<8x2xf32>
    %27 = vector.broadcast %cst_7 : f32 to vector<8x2xf32>
    %28 = arith.select %24, %26, %27 : vector<8x2xi1>, vector<8x2xf32>
    %cst_8 = arith.constant dense<0.000000e+00> : vector<8xf32>
    %29 = vector.multi_reduction <add>, %28, %cst_8 [1] : vector<8x2xf32> to vector<8xf32>
    %30 = vector.shape_cast %29 : vector<8xf32> to vector<8x1xf32>
    %31 = vector.broadcast %21 : vector<8x1xf32> to vector<8x2xf32>
    %32 = arith.subf %31, %12 : vector<8x2xf32>
    %33 = arith.mulf %28, %32 : vector<8x2xf32>
    %cst_9 = arith.constant dense<0.000000e+00> : vector<8xf32>
    %34 = vector.multi_reduction <add>, %33, %cst_9 [1] : vector<8x2xf32> to vector<8xf32>
    %35 = vector.shape_cast %34 : vector<8xf32> to vector<8x1xf32>
    %c1_i32 = arith.constant 1 : i32
    %36 = arith.muli %arg0, %c1_i32 : i32
    %37 = arith.addi %36, %arg1 : i32
    %c8_i32 = arith.constant 8 : i32
    %38 = arith.muli %37, %c8_i32 : i32
    %39 = tpu.iota {dimensions = array<i32: 0>} : vector<8x1xi32>
    %40 = vector.broadcast %38 : i32 to vector<8x1xi32>
    %41 = arith.addi %40, %39 : vector<8x1xi32>
    %c8_i32_10 = arith.constant 8 : i32
    %42 = vector.broadcast %c8_i32_10 : i32 to vector<8x1xi32>
    %43 = arith.cmpi slt, %41, %42 : vector<8x1xi32>
    %cst_11 = arith.constant 0.000000e+00 : f32
    %44 = vector.broadcast %cst_11 : f32 to vector<8x1xf32>
    %45 = arith.select %43, %35, %44 : vector<8x1xi1>, vector<8x1xf32>
    %cst_12 = arith.constant 0.000000e+00 : f32
    %46 = vector.broadcast %cst_12 : f32 to vector<8x1xf32>
    %47 = arith.select %43, %30, %46 : vector<8x1xi1>, vector<8x1xf32>
    %c0_13 = arith.constant 0 : index
    %c0_14 = arith.constant 0 : index
    %48 = vector.load %arg6[%c0_13, %c0_14] : memref<1x1xf32, #tpu.memory_space<vmem>>, vector<1x1xf32>
    %cst_15 = arith.constant dense<0.000000e+00> : vector<1xf32>
    %49 = vector.multi_reduction <add>, %45, %cst_15 [0] : vector<8x1xf32> to vector<1xf32>
    %50 = vector.shape_cast %49 : vector<1xf32> to vector<1x1xf32>
    %51 = arith.addf %48, %50 : vector<1x1xf32>
    %c0_16 = arith.constant 0 : index
    %c0_17 = arith.constant 0 : index
    %52 = vector.load %arg6[%c0_16, %c0_17] : memref<1x1xf32, #tpu.memory_space<vmem>>, vector<1x1xf32>
    tpu.vector_store %arg6[%c0_16, %c0_17], %51 {strides = array<i32>} : memref<1x1xf32, #tpu.memory_space<vmem>>, vector<1x1xf32>,
    %c0_18 = arith.constant 0 : index
    %c0_19 = arith.constant 0 : index
    %53 = vector.load %arg7[%c0_18, %c0_19] : memref<1x1xf32, #tpu.memory_space<vmem>>, vector<1x1xf32>
    %cst_20 = arith.constant dense<0.000000e+00> : vector<1xf32>
    %54 = vector.multi_reduction <add>, %47, %cst_20 [0] : vector<8x1xf32> to vector<1xf32>
    %55 = vector.shape_cast %54 : vector<1xf32> to vector<1x1xf32>
    %56 = arith.addf %53, %55 : vector<1x1xf32>
    %c0_21 = arith.constant 0 : index
    %c0_22 = arith.constant 0 : index
    %57 = vector.load %arg7[%c0_21, %c0_22] : memref<1x1xf32, #tpu.memory_space<vmem>>, vector<1x1xf32>
    tpu.vector_store %arg7[%c0_21, %c0_22], %56 {strides = array<i32>} : memref<1x1xf32, #tpu.memory_space<vmem>>, vector<1x1xf32>,
    %c0_i32_23 = arith.constant 0 : i32
    %58 = arith.cmpi eq, %arg1, %c0_i32_23 : i32
    %59 = arith.extui %58 : i1 to i32
    %c0_i32_24 = arith.constant 0 : i32
    %60 = arith.cmpi ne, %59, %c0_i32_24 : i32
    scf.if %60 {
      %c0_25 = arith.constant 0 : index
      %c0_26 = arith.constant 0 : index
      %61 = vector.load %arg6[%c0_25, %c0_26] : memref<1x1xf32, #tpu.memory_space<vmem>>, vector<1x1xf32>
      %62 = vector.shape_cast %61 : vector<1x1xf32> to vector<1x1x1xf32>
      %c0_27 = arith.constant 0 : index
      %c0_28 = arith.constant 0 : index
      %c0_29 = arith.constant 0 : index
      %63 = vector.load %arg5[%c0_27, %c0_28, %c0_29] : memref<1x2x1xf32, #tpu.memory_space<vmem>>, vector<1x1x1xf32>
      tpu.vector_store %arg5[%c0_27, %c0_28, %c0_29], %62 {strides = array<i32>} : memref<1x2x1xf32, #tpu.memory_space<vmem>>, vector<1x1x1xf32>,
      %c0_30 = arith.constant 0 : index
      %c0_31 = arith.constant 0 : index
      %64 = vector.load %arg7[%c0_30, %c0_31] : memref<1x1xf32, #tpu.memory_space<vmem>>, vector<1x1xf32>
      %65 = vector.shape_cast %64 : vector<1x1xf32> to vector<1x1x1xf32>
      %c0_32 = arith.constant 0 : index
      %c1 = arith.constant 1 : index
      %c0_33 = arith.constant 0 : index
      %66 = vector.load %arg5[%c0_32, %c1, %c0_33] : memref<1x2x1xf32, #tpu.memory_space<vmem>>, vector<1x1x1xf32>
      tpu.vector_store %arg5[%c0_32, %c1, %c0_33], %65 {strides = array<i32>} : memref<1x2x1xf32, #tpu.memory_space<vmem>>, vector<1x1x1xf32>,
    } else {
    }
    return
  }
  func.func @transform_0(%arg0: i32, %arg1: i32) -> (i32, i32) {
    %c1_i32 = arith.constant 1 : i32
    %0 = arith.muli %arg0, %c1_i32 : i32
    %1 = arith.addi %0, %arg1 : i32
    %c0_i32 = arith.constant 0 : i32
    %2 = arith.minsi %1, %c0_i32 : i32
    %c0_i32_0 = arith.constant 0 : i32
    %c0_i32_1 = arith.constant 0 : i32
    return %2, %c0_i32_0 : i32, i32
  }
  func.func @transform_1(%arg0: i32, %arg1: i32) -> (i32, i32) {
    %c1_i32 = arith.constant 1 : i32
    %0 = arith.muli %arg0, %c1_i32 : i32
    %1 = arith.addi %0, %arg1 : i32
    %c0_i32 = arith.constant 0 : i32
    %2 = arith.minsi %1, %c0_i32 : i32
    %c0_i32_0 = arith.constant 0 : i32
    %c0_i32_1 = arith.constant 0 : i32
    return %2, %c0_i32_0 : i32, i32
  }
  func.func @transform_2(%arg0: i32, %arg1: i32) -> (i32, i32) {
    %c0_i32 = arith.constant 0 : i32
    %c0_i32_0 = arith.constant 0 : i32
    %c0_i32_1 = arith.constant 0 : i32
    return %c0_i32, %c0_i32_0 : i32, i32
  }
  func.func @transform_3(%arg0: i32, %arg1: i32) -> (i32, i32, i32) {
    %c0_i32 = arith.constant 0 : i32
    %c0_i32_0 = arith.constant 0 : i32
    %c0_i32_1 = arith.constant 0 : i32
    return %arg0, %c0_i32, %c0_i32_0 : i32, i32, i32
  }
}

</mosaic_0001>

<bundles_post_ra>
// kernel: tpu_custom_call.1
= control target key start
LH: loop header
LB: loop body
LE: loop exit
PB: predicated region body
PF: predicated region fallthrough
CT: control target
= control target key end

     0   :  { %v78_v0 = vlaneseq  ;;  %vm88_vm0 = vcmask 15360   ;;  %v179_v11 = vmov 0   ;;  %vm72_vm2 = vcmask 0   ;;  %s226_s2 = inlined_call_operand.vmem [shape: f32[3,2], index: 2, kind: input, shape index: {}]   ;;  %s227_s0 = inlined_call_operand.vmem [shape: f32[8,2], index: 0, kind: input, shape index: {}]   ;;  %s228_s1 = inlined_call_operand.vmem [shape: s32[8,1], index: 1, kind: input, shape index: {}]   ;;  %s229_s3 = inlined_call_operand.vmem [shape: f32[1,2,1], index: 3, kind: output, shape index: {}]  }
   0x1   :  { %v77_v2 = vld [vmem:[%s226_s2] sm:$0x7]  ;;  %173 = vset.pattern.permute.xlu1 %v179_v11  ;;  %174 = vset.pattern.permute.xlu0 %v179_v11  ;;  %v180_v24 = vmov 0.0  }
   0x2   :  { %v79_v1 = vshrl.u32 %v78_v0, 7  ;;  %v75_v5 = vld [vmem:[%s227_s0] sm:$0xff]  ;;  %v102_v19 = vand.u32 127, %v78_v0  ;;  %74 = vst.msk [vmem:[#allocation3] sm:$0x1] %vm72_vm2, %v180_v24 }
   0x3   :  { %v76_v12 = vld [vmem:[%s228_s1] sm:$0xff]  ;;  %73 = vst.msk [vmem:[#allocation2] sm:$0x1] %vm72_vm2, %v180_v24 }
   0x4   :  { %v80_v3 = vsub.s32 0, %v79_v1  ;;  %v85_v4 = vsub.s32 1, %v79_v1  ;;  %104 = vperm.xlu1 %173, %v76_v12   ;;  %v109_v18 = vsub.s32 2, %v79_v1 }
   0x6   :  { %v81_v6 = vrot.slane %v77_v2, %v80_v3  ;;  %v86_v7 = vrot.slane %v77_v2, %v85_v4  ;;  %v110_v21 = vrot.slane %v77_v2, %v109_v18 }
   0x8   :  { %v82_v8 = vmul.f32 %v81_v6, %v75_v5 }
   0x9   :  { %v139_v38 = vld [vmem:[#allocation3] sm:$0x1] }
   0xa   :  { %v87_v9 = vadd.f32 %v86_v7, %v82_v8  ;;  %v129_v48 = vld [vmem:[#allocation2] sm:$0x1] }
   0xc   :  { %v89_v10 = vsel %vm88_vm0, %v87_v9, -inf }
   0xd   :  { %90 = vmax.xlane.f32.xlu0 %v89_v10 }
  0x7f   :  { %v105_v20 = vpop.permute.xlu1 %104 }
  0x80   :  { %vm106_vm1 = vcmp.eq.s32.totalorder %v102_v19, %v105_v20 }
  0x81   :  { %v111_v22 = vsel %vm106_vm1, %v110_v21, 0.0 }
  0x82   :  { %v112_v23 = vsel %vm88_vm0, %v111_v22, 0.0 }
  0x83   :  { %113 = vadd.xlane.f32.xlu1 %v112_v23 }
  0x96   :  { %v91_v13 = vpop.xlane.xlu0 %90 }
  0x97   :  { %v92_v14 = vsub.f32 %v87_v9, %v91_v13 }
  0x99   :  { %v93_v15 = vmul.f32 1.442695, %v92_v14 }
  0x9b   :  { %175 = vpow2.f32 %v93_v15 }
  0xa8   :  { %v176_v16 = vpop.eup %175 }
  0xa9   :  { %v95_v17 = vsel %vm88_vm0, %v176_v16, 0.0 }
  0xaa   :  { %96 = vadd.xlane.f32.xlu0 %v95_v17 }
 0x10c   :  { %v114_v32 = vpop.xlane.xlu1 %113 }
 0x10d   :  { %v140_v33 = vrot.slane %v114_v32, 4 }
 0x10f   :  { %v141_v34 = vadd.f32 %v140_v33, %v114_v32 }
 0x111   :  { %v142_v35 = vrot.slane %v141_v34, 2 }
 0x113   :  { %v143_v36 = vadd.f32 %v142_v35, %v141_v34 }
 0x115   :  { %v144_v37 = vrot.slane %v143_v36, 1 }
 0x117   :  { %v145_v39 = vadd.f32 %v144_v37, %v143_v36 }
 0x119   :  { %v146_v40 = vadd.f32 %v145_v39, %v139_v38 }
 0x11b   :  { %147 = vst.msk [vmem:[#allocation3] sm:$0x1] %vm72_vm2, %v146_v40 }
 0x122   :  { %v153_v41 = vld [vmem:[#allocation3] sm:$0x1] }
 0x123   :  { %154 = vst.msk [vmem:[%s229_s3 + $0x1] sm:$0x1] %vm72_vm2, %v153_v41 }
 0x133   :  { %v97_v25 = vpop.xlane.xlu0 %96 }
 0x134   :  { %177 = vlog2.f32 %v97_v25 }
 0x141   :  { %v178_v26 = vpop.eup %177 }
 0x142   :  { %v99_v27 = vmul.f32 0.6931472, %v178_v26 }
 0x144   :  { %v100_v28 = vadd.f32 %v99_v27, %v91_v13 }
 0x146   :  { %v115_v29 = vsub.f32 %v100_v28, %v87_v9 }
 0x148   :  { %v116_v30 = vmul.f32 %v115_v29, %v111_v22 }
 0x14a   :  { %v117_v31 = vsel %vm88_vm0, %v116_v30, 0.0 }
 0x14b   :  { %118 = vadd.xlane.f32.xlu0 %v117_v31 }
 0x1d4   :  { %v119_v42 = vpop.xlane.xlu0 %118 }
 0x1d5   :  { %v130_v43 = vrot.slane %v119_v42, 4 }
 0x1d7   :  { %v131_v44 = vadd.f32 %v130_v43, %v119_v42 }
 0x1d9   :  { %v132_v45 = vrot.slane %v131_v44, 2 }
 0x1db   :  { %v133_v46 = vadd.f32 %v132_v45, %v131_v44 }
 0x1dd   :  { %v134_v47 = vrot.slane %v133_v46, 1 }
 0x1df   :  { %v135_v49 = vadd.f32 %v134_v47, %v133_v46 }
 0x1e1   :  { %v136_v50 = vadd.f32 %v135_v49, %v129_v48 }
 0x1e3   :  { %138 = vst.msk [vmem:[#allocation2] sm:$0x1] %vm72_vm2, %v136_v50 }
 0x1ea   :  { %v151_v51 = vld [vmem:[#allocation2] sm:$0x1] }
 0x1eb   :  { %152 = vst.msk [vmem:[%s229_s3] sm:$0x1] %vm72_vm2, %v151_v51 }

</bundles_post_ra>
